<compile_context>
chip_gen: v7x
topology: tpu7x:2x2x1
jax: 0.10.0
libtpu: 0.0.40
codegen_flags: <defaults>
</compile_context>

<pallas_src>
import jax
import jax.numpy as jnp
from jax.experimental import pallas as pl
from jax.experimental.pallas import tpu as pltpu

_LANE = 128
_BATCH_GRANULE = 16  # bf16 activation sublane packing


def _round_up(x, m):
    return ((x + m - 1) // m) * m


def _cdiv(a, b):
    return (a + b - 1) // b


# ---------------------------------------------------------------------------
# Kernel: 3 bf16 matmuls (f32 accumulate) + 2 ReLUs + f32 bias adds.
# ---------------------------------------------------------------------------
def mlp_kernel(x_ref, w1_ref, b1_ref, w2_ref, b2_ref, w3_ref, b3_ref, o_ref):
    x = x_ref[...]  # bf16 [tb, in_dim]

    # Linear(input_dim, hidden_p) + ReLU
    h = jnp.dot(x, w1_ref[...], preferred_element_type=jnp.float32) + b1_ref[...]
    h = jnp.maximum(h, 0.0)

    # Dropout(0.3): identity in eval mode.

    # Linear(hidden_p, hidden_p) + ReLU
    h = jnp.dot(h.astype(jnp.bfloat16), w2_ref[...],
                preferred_element_type=jnp.float32) + b2_ref[...]
    h = jnp.maximum(h, 0.0)

    # BatchNorm1d(eval) has been folded into w3/b3 at parameter-prep time.
    # Linear(hidden_p, classes_p)
    o_ref[...] = (jnp.dot(h.astype(jnp.bfloat16), w3_ref[...],
                          preferred_element_type=jnp.float32)
                  + b3_ref[...]).astype(o_ref.dtype)


# ---------------------------------------------------------------------------
# Parameter preparation: fold BN (in f32), pad to 128 lanes, cast weights bf16.
# ---------------------------------------------------------------------------
def prepare_inference_params(params, eps=1e-5, lane=_LANE):
    """Fold eval-mode BatchNorm into the final Linear, zero-pad the hidden and
    class dims to a multiple of the 128-lane vreg width, and cast weight
    matrices to bf16 (biases stay f32).  Padded hidden lanes remain exactly
    zero through ReLU (zero w-columns, zero biases), so they contribute
    nothing to the final matmul."""
    w1, b1 = params["w1"], params["b1"]
    w2, b2 = params["w2"], params["b2"]
    w3, b3 = params["w3"], params["b3"]
    gamma = params["gamma"].reshape(-1)
    beta = params["beta"].reshape(-1)
    mean = params["running_mean"].reshape(-1)
    var = params["running_var"].reshape(-1)

    # Eval-mode BN: y = h*scale + shift ; fold into the last Linear (f32).
    scale = gamma * jax.lax.rsqrt(var + eps)
    shift = beta - mean * scale
    w3f = scale[:, None] * w3
    b3f = b3.reshape(-1) + shift @ w3

    in_dim, hid = w1.shape
    num_classes = w3.shape[1]
    hp = _round_up(hid, lane)
    cp = _round_up(num_classes, lane)

    def pad2(a, rows, cols, dtype):
        a = jnp.pad(a, ((0, rows - a.shape[0]), (0, cols - a.shape[1])))
        return a.astype(dtype)

    kp = dict(
        w1=pad2(w1, in_dim, hp, jnp.bfloat16),
        b1=pad2(b1.reshape(1, -1), 1, hp, jnp.float32),
        w2=pad2(w2, hp, hp, jnp.bfloat16),
        b2=pad2(b2.reshape(1, -1), 1, hp, jnp.float32),
        w3=pad2(w3f, hp, cp, jnp.bfloat16),
        b3=pad2(b3f.reshape(1, -1), 1, cp, jnp.float32),
    )
    return kp, num_classes


def _tpu_generation():
    try:
        return jax.devices()[0].device_kind.lower()
    except Exception:
        return ""


def _resident_spec(shape):
    """Grid-invariant block: constant index_map, single pipeline buffer."""
    try:
        return pl.BlockSpec(shape, lambda i: (0, 0),
                            pipeline_mode=pl.Buffered(buffer_count=1))
    except TypeError:
        # Older Pallas without pipeline_mode on BlockSpec: fall back to default.
        return pl.BlockSpec(shape, lambda i: (0, 0))


# ---------------------------------------------------------------------------
# Forward wrapper
# ---------------------------------------------------------------------------
def mlp_classifier_forward(x, kernel_params, num_classes, tile_batch=None):
    """x: [B, input_dim] float32. kernel_params: output of prepare_inference_params."""
    kp = kernel_params
    B, in_dim = x.shape
    hp = kp["w1"].shape[1]
    cp = kp["w3"].shape[1]

    kind = _tpu_generation()
    if "v6" in kind:
        vmem_budget = 96 << 20            # v6e: 128 MiB physical, room to spare
        tb_cap = tile_batch or 1024
        vmem_cap = 100 << 20
    else:
        vmem_budget = 44 << 20            # conservative: fits v7x's 64 MiB / TC
        tb_cap = tile_batch or 512
        vmem_cap = 60 << 20

    weight_bytes = sum(int(a.size) * a.dtype.itemsize for a in kp.values())

    # Per-batch-row VMEM cost: bf16 x (double-buffered) + f32 out (double-
    # buffered) + ~2 live f32 hidden temporaries across the matmul chain.
    per_row = 2 * in_dim * 2 + 2 * cp * 4 + 2 * hp * 4
    avail = max(vmem_budget - weight_bytes, 64 * per_row)
    tb = min(tb_cap,
             max(_BATCH_GRANULE, (avail // per_row) // _BATCH_GRANULE * _BATCH_GRANULE))

    # Grid shaping: >=2 steps for non-trivial batches (feeds both v7x TCs) and
    # remainder-aware tile shrink so batch padding is a few rows, not a tile.
    n_steps = max(2, _cdiv(B, tb)) if B >= 64 else 1
    tb = _round_up(_cdiv(B, n_steps), _BATCH_GRANULE)
    bp = tb * n_steps

    if bp != B:
        x = jnp.pad(x, ((0, bp - B), (0, 0)))
    x = x.astype(jnp.bfloat16)

    grid = (n_steps,)

    footprint = (weight_bytes
                 + 2 * tb * in_dim * 2    # x double buffer (bf16)
                 + 2 * tb * cp * 4        # out double buffer (f32)
                 + 2 * tb * hp * 4)       # live hidden temporaries (f32)
    vmem_limit = min(max(int(footprint * 1.25), 16 << 20), vmem_cap)

    flops = 2 * bp * (in_dim * hp + hp * hp + hp * cp)
    bytes_accessed = 2 * bp * in_dim + 4 * bp * cp + weight_bytes

    out = pl.pallas_call(
        mlp_kernel,
        out_shape=jax.ShapeDtypeStruct((bp, cp), jnp.float32),
        grid=grid,
        in_specs=[
            # activations: tiled over the batch grid
            pl.BlockSpec((tb, in_dim), lambda i: (i, 0)),
            # weights / biases: full-array resident blocks, single-buffered
            _resident_spec(kp["w1"].shape),
            _resident_spec(kp["b1"].shape),
            _resident_spec(kp["w2"].shape),
            _resident_spec(kp["b2"].shape),
            _resident_spec(kp["w3"].shape),
            _resident_spec(kp["b3"].shape),
        ],
        out_specs=pl.BlockSpec((tb, cp), lambda i: (i, 0)),
        compiler_params=pltpu.CompilerParams(
            dimension_semantics=("parallel",),
            vmem_limit_bytes=vmem_limit),
        cost_estimate=pl.CostEstimate(
            flops=flops, transcendentals=0, bytes_accessed=bytes_accessed),
    )(x, kp["w1"], kp["b1"], kp["w2"], kp["b2"], kp["w3"], kp["b3"])

    # Strip batch padding and the zero-padded class lanes.
    return out[:B, :num_classes]


# ---------------------------------------------------------------------------
# Init (mimics nn.Linear default init; weights stored pre-transposed [in, out])
# ---------------------------------------------------------------------------
def init_params(key, input_dim, hidden_dim, num_classes):
    ks = jax.random.split(key, 10)

    def linear(kw, kb, fan_in, fan_out):
        bound = 1.0 / jnp.sqrt(float(fan_in))
        w = jax.random.uniform(kw, (fan_in, fan_out), jnp.float32, -bound, bound)
        b = jax.random.uniform(kb, (1, fan_out), jnp.float32, -bound, bound)
        return w, b

    w1, b1 = linear(ks[0], ks[1], input_dim, hidden_dim)
    w2, b2 = linear(ks[2], ks[3], hidden_dim, hidden_dim)
    w3, b3 = linear(ks[4], ks[5], hidden_dim, num_classes)

    # Non-trivial BN stats so the folding path is actually exercised.
    gamma = jax.random.uniform(ks[6], (1, hidden_dim), jnp.float32, 0.5, 1.5)
    beta = 0.1 * jax.random.normal(ks[7], (1, hidden_dim), jnp.float32)
    running_mean = 0.1 * jax.random.normal(ks[8], (1, hidden_dim), jnp.float32)
    running_var = jax.random.uniform(ks[9], (1, hidden_dim), jnp.float32, 0.5, 1.5)

    return dict(w1=w1, b1=b1, w2=w2, b2=b2,
                gamma=gamma, beta=beta,
                running_mean=running_mean, running_var=running_var,
                w3=w3, b3=b3)


def _reference(x, p):
    h = jnp.maximum(x @ p["w1"] + p["b1"], 0.0)
    h = jnp.maximum(h @ p["w2"] + p["b2"], 0.0)
    h = (h - p["running_mean"]) * jax.lax.rsqrt(p["running_var"] + 1e-5) \
        * p["gamma"] + p["beta"]
    return h @ p["w3"] + p["b3"]


if __name__ == "__main__":
    key = jax.random.PRNGKey(0)
    k_x, k_p = jax.random.split(key)

    batch, input_dim, hidden_dim, num_classes = 8, 32, 64, 10
    x = jax.random.normal(k_x, (batch, input_dim), jnp.float32)
    params = init_params(k_p, input_dim, hidden_dim, num_classes)

    kernel_params, n_cls = prepare_inference_params(params)
    out = mlp_classifier_forward(x, kernel_params, n_cls)
    jax.block_until_ready(out)

    ref = _reference(x, params)
    assert out.shape == (batch, num_classes)
    # bf16 weights/activations (f32 accumulate) -> relaxed tolerance vs f32 ref.
    assert jnp.allclose(out, ref, atol=3e-2, rtol=3e-2), \
        float(jnp.max(jnp.abs(out - ref)))

    print("KERNEL_OK")
</pallas_src>

<mosaic_0001>
module attributes {stable_mosaic.version = 11 : i64} {
  func.func @mlp_kernel(%arg0: i32, %arg1: memref<16x32xbf16, #tpu.memory_space<vmem>>, %arg2: memref<32x128xbf16, #tpu.memory_space<vmem>>, %arg3: memref<1x128xf32, #tpu.memory_space<vmem>>, %arg4: memref<128x128xbf16, #tpu.memory_space<vmem>>, %arg5: memref<1x128xf32, #tpu.memory_space<vmem>>, %arg6: memref<128x128xbf16, #tpu.memory_space<vmem>>, %arg7: memref<1x128xf32, #tpu.memory_space<vmem>>, %arg8: memref<16x128xf32, #tpu.memory_space<vmem>>) attributes {dimension_semantics = [#tpu.dimension_semantics<parallel>], iteration_bounds = array<i64: 1>, scalar_prefetch = 0 : i64, scratch_operands = 0 : i64, tpu.core_type = #tpu.core_type<tc>, window_params = [{transform_indices = @transform_0, window_bounds = array<i64: 16, 32>}, {pipeline_mode = #tpu.pipeline_mode<synchronous>, transform_indices = @transform_1, window_bounds = array<i64: 32, 128>}, {pipeline_mode = #tpu.pipeline_mode<synchronous>, transform_indices = @transform_2, window_bounds = array<i64: 1, 128>}, {pipeline_mode = #tpu.pipeline_mode<synchronous>, transform_indices = @transform_3, window_bounds = array<i64: 128, 128>}, {pipeline_mode = #tpu.pipeline_mode<synchronous>, transform_indices = @transform_4, window_bounds = array<i64: 1, 128>}, {pipeline_mode = #tpu.pipeline_mode<synchronous>, transform_indices = @transform_5, window_bounds = array<i64: 128, 128>}, {pipeline_mode = #tpu.pipeline_mode<synchronous>, transform_indices = @transform_6, window_bounds = array<i64: 1, 128>}, {transform_indices = @transform_7, window_bounds = array<i64: 16, 128>}]} {
    %c0 = arith.constant 0 : index
    %c0_0 = arith.constant 0 : index
    %0 = vector.load %arg1[%c0, %c0_0] : memref<16x32xbf16, #tpu.memory_space<vmem>>, vector<16x32xbf16>
    %c0_1 = arith.constant 0 : index
    %c0_2 = arith.constant 0 : index
    %1 = vector.load %arg2[%c0_1, %c0_2] : memref<32x128xbf16, #tpu.memory_space<vmem>>, vector<32x128xbf16>
    %cst = arith.constant dense<0.000000e+00> : vector<16x128xf32>
    %2 = tpu.matmul %0, %1, %cst {dimension_numbers = #tpu.dot_dimension_numbers<[1], [0], [0], [1], [0, 0, 1, 1], [], []>} : vector<16x32xbf16>, vector<32x128xbf16>, vector<16x128xf32> -> vector<16x128xf32>
    %c0_3 = arith.constant 0 : index
    %c0_4 = arith.constant 0 : index
    %3 = vector.load %arg3[%c0_3, %c0_4] : memref<1x128xf32, #tpu.memory_space<vmem>>, vector<1x128xf32>
    %4 = vector.broadcast %3 : vector<1x128xf32> to vector<16x128xf32>
    %5 = arith.addf %2, %4 : vector<16x128xf32>
    %cst_5 = arith.constant 0.000000e+00 : f32
    %6 = vector.broadcast %cst_5 : f32 to vector<16x128xf32>
    %7 = arith.maximumf %5, %6 : vector<16x128xf32>
    %8 = arith.truncf %7 : vector<16x128xf32> to vector<16x128xbf16>
    %c0_6 = arith.constant 0 : index
    %c0_7 = arith.constant 0 : index
    %9 = vector.load %arg4[%c0_6, %c0_7] : memref<128x128xbf16, #tpu.memory_space<vmem>>, vector<128x128xbf16>
    %cst_8 = arith.constant dense<0.000000e+00> : vector<16x128xf32>
    %10 = tpu.matmul %8, %9, %cst_8 {dimension_numbers = #tpu.dot_dimension_numbers<[1], [0], [0], [1], [0, 0, 1, 1], [], []>} : vector<16x128xbf16>, vector<128x128xbf16>, vector<16x128xf32> -> vector<16x128xf32>
    %c0_9 = arith.constant 0 : index
    %c0_10 = arith.constant 0 : index
    %11 = vector.load %arg5[%c0_9, %c0_10] : memref<1x128xf32, #tpu.memory_space<vmem>>, vector<1x128xf32>
    %12 = vector.broadcast %11 : vector<1x128xf32> to vector<16x128xf32>
    %13 = arith.addf %10, %12 : vector<16x128xf32>
    %cst_11 = arith.constant 0.000000e+00 : f32
    %14 = vector.broadcast %cst_11 : f32 to vector<16x128xf32>
    %15 = arith.maximumf %13, %14 : vector<16x128xf32>
    %16 = arith.truncf %15 : vector<16x128xf32> to vector<16x128xbf16>
    %c0_12 = arith.constant 0 : index
    %c0_13 = arith.constant 0 : index
    %17 = vector.load %arg6[%c0_12, %c0_13] : memref<128x128xbf16, #tpu.memory_space<vmem>>, vector<128x128xbf16>
    %cst_14 = arith.constant dense<0.000000e+00> : vector<16x128xf32>
    %18 = tpu.matmul %16, %17, %cst_14 {dimension_numbers = #tpu.dot_dimension_numbers<[1], [0], [0], [1], [0, 0, 1, 1], [], []>} : vector<16x128xbf16>, vector<128x128xbf16>, vector<16x128xf32> -> vector<16x128xf32>
    %c0_15 = arith.constant 0 : index
    %c0_16 = arith.constant 0 : index
    %19 = vector.load %arg7[%c0_15, %c0_16] : memref<1x128xf32, #tpu.memory_space<vmem>>, vector<1x128xf32>
    %20 = vector.broadcast %19 : vector<1x128xf32> to vector<16x128xf32>
    %21 = arith.addf %18, %20 : vector<16x128xf32>
    %c0_17 = arith.constant 0 : index
    %c0_18 = arith.constant 0 : index
    %22 = vector.load %arg8[%c0_17, %c0_18] : memref<16x128xf32, #tpu.memory_space<vmem>>, vector<16x128xf32>
    tpu.vector_store %arg8[%c0_17, %c0_18], %21 {strides = array<i32>} : memref<16x128xf32, #tpu.memory_space<vmem>>, vector<16x128xf32>,
    return
  }
  func.func @transform_0(%arg0: i32) -> (i32, i32) {
    %c0_i32 = arith.constant 0 : i32
    %c0_i32_0 = arith.constant 0 : i32
    return %arg0, %c0_i32 : i32, i32
  }
  func.func @transform_1(%arg0: i32) -> (i32, i32) {
    %c0_i32 = arith.constant 0 : i32
    %c0_i32_0 = arith.constant 0 : i32
    %c0_i32_1 = arith.constant 0 : i32
    return %c0_i32, %c0_i32_0 : i32, i32
  }
  func.func @transform_2(%arg0: i32) -> (i32, i32) {
    %c0_i32 = arith.constant 0 : i32
    %c0_i32_0 = arith.constant 0 : i32
    %c0_i32_1 = arith.constant 0 : i32
    return %c0_i32, %c0_i32_0 : i32, i32
  }
  func.func @transform_3(%arg0: i32) -> (i32, i32) {
    %c0_i32 = arith.constant 0 : i32
    %c0_i32_0 = arith.constant 0 : i32
    %c0_i32_1 = arith.constant 0 : i32
    return %c0_i32, %c0_i32_0 : i32, i32
  }
  func.func @transform_4(%arg0: i32) -> (i32, i32) {
    %c0_i32 = arith.constant 0 : i32
    %c0_i32_0 = arith.constant 0 : i32
    %c0_i32_1 = arith.constant 0 : i32
    return %c0_i32, %c0_i32_0 : i32, i32
  }
  func.func @transform_5(%arg0: i32) -> (i32, i32) {
    %c0_i32 = arith.constant 0 : i32
    %c0_i32_0 = arith.constant 0 : i32
    %c0_i32_1 = arith.constant 0 : i32
    return %c0_i32, %c0_i32_0 : i32, i32
  }
  func.func @transform_6(%arg0: i32) -> (i32, i32) {
    %c0_i32 = arith.constant 0 : i32
    %c0_i32_0 = arith.constant 0 : i32
    %c0_i32_1 = arith.constant 0 : i32
    return %c0_i32, %c0_i32_0 : i32, i32
  }
  func.func @transform_7(%arg0: i32) -> (i32, i32) {
    %c0_i32 = arith.constant 0 : i32
    %c0_i32_0 = arith.constant 0 : i32
    return %arg0, %c0_i32 : i32, i32
  }
}

</mosaic_0001>

<bundles_post_ra>
// kernel: tpu_custom_call.1
= control target key start
LH: loop header
LB: loop body
LE: loop exit
PB: predicated region body
PF: predicated region fallthrough
CT: control target
= control target key end

     0   :  { %12 = vsyncpa [#allocation3], 0  ;;  %s819_s0 = inlined_call_operand.hbm [shape: bf16[16,32], index: 0, kind: input, shape index: {}]   ;;  %s820_s1 = inlined_call_operand.hbm [shape: bf16[32,128], index: 1, kind: input, shape index: {}]   ;;  %s821_s2 = inlined_call_operand.vmem [shape: f32[1,128], index: 2, kind: input, shape index: {}]   ;;  %s822_s3 = inlined_call_operand.hbm [shape: bf16[128,128], index: 3, kind: input, shape index: {}]   ;;  %s823_s4 = inlined_call_operand.vmem [shape: f32[1,128], index: 4, kind: input, shape index: {}]   ;;  %s824_s5 = inlined_call_operand.hbm [shape: bf16[128,128], index: 5, kind: input, shape index: {}]   ;;  %s825_s6 = inlined_call_operand.vmem [shape: f32[1,128], index: 6, kind: input, shape index: {}]   ;;  %s826_s7 = inlined_call_operand.hbm [shape: f32[16,128], index: 7, kind: output, shape index: {}]  }
   0x1   :  { %13 = vsyncpa [#allocation6], 0 }
   0x2   :  { %14 = vsyncpa [#allocation9], 0 }
   0x3   :  { %15 = vsyncpa [#allocation4], 0  ;;  %s649_s24 = smov [#allocation5]   ;;  %s650_s26 = smov [#allocation2]  }
   0x4   :  { %s33_s25 = sshll.u32 %s649_s24, 4  ;;  %s21_s27 = sshll.u32 %s650_s26, 4  ;;  %s34_s25 = int_to_ptr.vmem [resolvable:$true] %s33_s25  ;;  %s700_s27 = int_to_ptr.vmem [resolvable:$true] %s21_s27 }
   0x5   :  { %s531_s30 = scalar_lea.hbm %s820_s1, 256 }
   0x6   :  { %p532_p0 = scmp.ne.s32.totalorder %s820_s1, %s531_s30  ;;  %p535_p1 = scmp.lt.u32.totalorder %s531_s30, %s820_s1 }
   0x8   :  { %p537_p2 = pnand %p535_p1, %p532_p0 }
   0xa   :  { %540 = shalt.err (!%p537_p2)
}
   0xb   :  { %s541_s12 = scalar_lea.vmem %s34_s25, 256  ;;  %p546_p4 = scmp.lt.s32.totalorder %s34_s25, %s34_s25 }
   0xc   :  { %p542_p3 = scmp.ne.s32.totalorder %s34_s25, %s541_s12  ;;  %p547_p5 = scmp.lt.s32.totalorder %s541_s12, %s541_s12 }
   0xe   :  { %p548_p6 = por %p547_p5, %p546_p4 }
  0x10   :  { %p549_p7 = pnand %p548_p6, %p542_p3 }
  0x12   :  { %552 = shalt.err (!%p549_p7)
}
  0x13   :  { %s651_s13 = smov 64   ;;  %s652_s14 = smov 4  }
  0x14   :  { %39 = dma.hbm_to_vmem [thread:$0]  %s820_s1, 256, %s34_s25, [#allocation6], %s651_s13, %s651_s13, %s652_s14  }
  0x15   :  { %s553_s19 = scalar_lea.hbm %s819_s0, 128 }
  0x16   :  { %p554_p8 = scmp.ne.s32.totalorder %s819_s0, %s553_s19  ;;  %p557_p9 = scmp.lt.u32.totalorder %s553_s19, %s819_s0 }
  0x18   :  { %p559_p10 = pnand %p557_p9, %p554_p8 }
  0x1a   :  { %562 = shalt.err (!%p559_p10)
}
  0x1b   :  { %s563_s24 = scalar_lea.vmem %s700_s27, 128  ;;  %p568_p12 = scmp.lt.s32.totalorder %s700_s27, %s700_s27 }
  0x1c   :  { %p564_p11 = scmp.ne.s32.totalorder %s700_s27, %s563_s24  ;;  %p569_p13 = scmp.lt.s32.totalorder %s563_s24, %s563_s24 }
  0x1e   :  { %p570_p0 = por %p569_p13, %p568_p12 }
  0x20   :  { %p571_p1 = pnand %p570_p0, %p564_p11 }
  0x22   :  { %574 = shalt.err (!%p571_p1)
}
  0x23   :  { %27 = dma.hbm_to_vmem [thread:$0]  %s819_s0, 128, %s700_s27, [#allocation3], %s651_s13, %s651_s13, %s652_s14  }
  0x24   :  { %s653_s26 = smov [#allocation7]   ;;  %s654_s29 = smov [#allocation8]  }
  0x25   :  { %s47_s28 = sshll.u32 %s653_s26, 4  ;;  %s61_s30 = sshll.u32 %s654_s29, 4  ;;  %s48_s28 = int_to_ptr.vmem [resolvable:$true] %s47_s28  ;;  %s737_s30 = int_to_ptr.vmem [resolvable:$true] %s61_s30 }
  0x26   :  { %s575_s10 = scalar_lea.hbm %s822_s3, 1024 }
  0x27   :  { %p576_p2 = scmp.ne.s32.totalorder %s822_s3, %s575_s10  ;;  %p579_p3 = scmp.lt.u32.totalorder %s575_s10, %s822_s3 }
  0x29   :  { %p581_p4 = pnand %p579_p3, %p576_p2 }
  0x2b   :  { %584 = shalt.err (!%p581_p4)
}
  0x2c   :  { %s585_s0 = scalar_lea.vmem %s48_s28, 1024  ;;  %p590_p6 = scmp.lt.s32.totalorder %s48_s28, %s48_s28 }
  0x2d   :  { %p586_p5 = scmp.ne.s32.totalorder %s48_s28, %s585_s0  ;;  %p591_p7 = scmp.lt.s32.totalorder %s585_s0, %s585_s0 }
  0x2f   :  { %p592_p8 = por %p591_p7, %p590_p6 }
  0x31   :  { %p593_p9 = pnand %p592_p8, %p586_p5 }
  0x33   :  { %596 = shalt.err (!%p593_p9)
}
  0x34   :  { %53 = dma.hbm_to_vmem [thread:$0]  %s822_s3, 1024, %s48_s28, [#allocation6], %s651_s13, %s651_s13, %s652_s14  }
  0x35   :  { %s597_s20 = scalar_lea.hbm %s824_s5, 1024 }
  0x36   :  { %p598_p10 = scmp.ne.s32.totalorder %s824_s5, %s597_s20  ;;  %p601_p11 = scmp.lt.u32.totalorder %s597_s20, %s824_s5 }
  0x38   :  { %p603_p12 = pnand %p601_p11, %p598_p10 }
  0x3a   :  { %606 = shalt.err (!%p603_p12)
}
  0x3b   :  { %s607_s1 = scalar_lea.vmem %s737_s30, 1024  ;;  %p612_p0 = scmp.lt.s32.totalorder %s737_s30, %s737_s30 }
  0x3c   :  { %p608_p13 = scmp.ne.s32.totalorder %s737_s30, %s607_s1  ;;  %p613_p1 = scmp.lt.s32.totalorder %s607_s1, %s607_s1 }
  0x3e   :  { %p614_p2 = por %p613_p1, %p612_p0 }
  0x40   :  { %p615_p3 = pnand %p614_p2, %p608_p13 }
  0x42   :  { %618 = shalt.err (!%p615_p3)
}
  0x43   :  { %67 = dma.hbm_to_vmem [thread:$0]  %s824_s5, 1024, %s737_s30, [#allocation9], %s651_s13, %s651_s13, %s652_s14  }
  0x44   :  { %641 = dma.done.wait [#allocation3], 128  }
  0x45   :  { %642 = vsyncadd [#allocation3], 4294967168 }
  0x46   :  { %643 = dma.done.wait [#allocation6], 1280  }
  0x47   :  { %644 = vsyncadd [#allocation6], 4294966016 }
  0x48   :  { %645 = dma.done.wait [#allocation9], 1024  }
  0x49   :  { %646 = vsyncadd [#allocation9], 4294966272  ;;  %v655_v0 = vmov 0.0   ;;  %vm656_vm0 = vmmov 0   ;;  %v512_v1 = vld [vmem:[#allocation5] sm:$0xff]   ;;  %v513_v2 = vld [vmem:[#allocation5 + $0x8] sm:$0xff]  }
  0x4a   :  { %453 = vmatprep.subr.bf16.mxu0 %v655_v0  ;;  %457 = vmatprep.mubr.msk.bf16.mxu0 %vm656_vm0, %v655_v0  ;;  %v515_v3 = vld [vmem:[#allocation7] sm:$0xff]   ;;  %v514_v4 = vld [vmem:[#allocation2] sm:$0xff]   ;;  %vm113_vm1 = vcmask 261120   ;;  %v517_v6 = vld [vmem:[#allocation7 + $0x10] sm:$0xff]   ;;  %s657_s29 = smov [#allocation10]  }
  0x4b   :  { %461 = vmatprep.subr.bf16.mxu1 %v655_v0  ;;  %477 = vmatprep.mubr.msk.bf16.mxu1 %vm656_vm0, %v655_v0  ;;  %v516_v5 = vld [vmem:[#allocation7 + $0x8] sm:$0xff]   ;;  %v518_v7 = vld [vmem:[#allocation7 + $0x18] sm:$0xff]   ;;  %v519_v8 = vld [vmem:[#allocation7 + $0x20] sm:$0xff]   ;;  %s395_s30 = sshll.u32 %s657_s29, 4  ;;  %s396_s30 = int_to_ptr.vmem [resolvable:$true] %s395_s30 }
  0x4c   :  { %454 = vmatpush3.bf16.msra.mxu0 %v512_v1  ;;  %462 = vmatpush3.bf16.msra.mxu1 %v515_v3  ;;  %v520_v9 = vld [vmem:[#allocation7 + $0x28] sm:$0xff]   ;;  %v521_v10 = vld [vmem:[#allocation7 + $0x30] sm:$0xff]   ;;  %v522_v11 = vld [vmem:[#allocation7 + $0x38] sm:$0xff]   ;;  %p624_p5 = scmp.lt.s32.totalorder %s396_s30, %s396_s30 }
  0x4d   :  { %455 = vmatprep.subr.bf16.mxu0 %v655_v0  ;;  %463 = vmatprep.subr.bf16.mxu1 %v655_v0  ;;  %v523_v12 = vld [vmem:[#allocation8] sm:$0xff]   ;;  %v524_v13 = vld [vmem:[#allocation8 + $0x8] sm:$0xff]   ;;  %v525_v14 = vld [vmem:[#allocation8 + $0x10] sm:$0xff]  }
  0x4e   :  { %v526_v15 = vld [vmem:[#allocation8 + $0x18] sm:$0xff]   ;;  %v527_v16 = vld [vmem:[#allocation8 + $0x20] sm:$0xff]   ;;  %v528_v17 = vld [vmem:[#allocation8 + $0x28] sm:$0xff]  }
  0x4f   :  { %v409_v18 = vld [vmem:[%s821_s2] ss:$0 sm:$0xff]  ;;  %v529_v28 = vld [vmem:[#allocation8 + $0x30] sm:$0xff]   ;;  %v530_v29 = vld [vmem:[#allocation8 + $0x38] sm:$0xff]  }
  0x50   :  { %456 = vmatpush3.bf16.msra.mxu0 %v513_v2  ;;  %464 = vmatpush3.bf16.msra.mxu1 %v516_v5  ;;  %v414_v30 = vld [vmem:[%s823_s4] ss:$0 sm:$0xff]  ;;  %s619_s4 = scalar_lea.vmem %s396_s30, 256 }
  0x51   :  { %481 = vmatprep.subr.bf16.mxu0 %v655_v0  ;;  %465 = vmatprep.subr.bf16.mxu1 %v655_v0  ;;  %v423_v40 = vld [vmem:[%s825_s6] ss:$0 sm:$0xff]  ;;  %p620_p4 = scmp.ne.s32.totalorder %s396_s30, %s619_s4  ;;  %p625_p6 = scmp.lt.s32.totalorder %s619_s4, %s619_s4 }
  0x53   :  { %458 = vmatmul.mubr.msk.bf16.vlgmr.msra.gmra.mrb[0].mxu0 %vm113_vm1, %v514_v4  ;;  %p626_p7 = por %p625_p6, %p624_p5 }
  0x54   :  { %497 = vmatprep.mubr.msk.bf16.mxu0 %vm656_vm0, %v655_v0  ;;  %466 = vmatpush3.bf16.msra.mxu1 %v517_v6 }
  0x55   :  { %467 = vmatprep.subr.bf16.mxu1 %v655_v0  ;;  %482 = vmatpush3.bf16.msra.mxu0 %v523_v12  ;;  %p627_p8 = pnand %p626_p7, %p620_p4 }
  0x56   :  { %483 = vmatprep.subr.bf16.mxu0 %v655_v0 }
  0x58   :  { %468 = vmatpush3.bf16.msra.mxu1 %v518_v7 }
  0x59   :  { %469 = vmatprep.subr.bf16.mxu1 %v655_v0  ;;  %484 = vmatpush3.bf16.msra.mxu0 %v524_v13 }
  0x5a   :  { %485 = vmatprep.subr.bf16.mxu0 %v655_v0 }
  0x5c   :  { %470 = vmatpush3.bf16.msra.mxu1 %v519_v8 }
  0x5d   :  { %471 = vmatprep.subr.bf16.mxu1 %v655_v0  ;;  %486 = vmatpush3.bf16.msra.mxu0 %v525_v14 }
  0x5e   :  { %487 = vmatprep.subr.bf16.mxu0 %v655_v0 }
  0x60   :  { %472 = vmatpush3.bf16.msra.mxu1 %v520_v9 }
  0x61   :  { %473 = vmatprep.subr.bf16.mxu1 %v655_v0  ;;  %488 = vmatpush3.bf16.msra.mxu0 %v526_v15 }
  0x62   :  { %489 = vmatprep.subr.bf16.mxu0 %v655_v0 }
  0x64   :  { %474 = vmatpush3.bf16.msra.mxu1 %v521_v10 }
  0x65   :  { %475 = vmatprep.subr.bf16.mxu1 %v655_v0  ;;  %490 = vmatpush3.bf16.msra.mxu0 %v527_v16 }
  0x66   :  { %491 = vmatprep.subr.bf16.mxu0 %v655_v0 }
  0x68   :  { %476 = vmatpush3.bf16.msra.mxu1 %v522_v11 }
  0x69   :  { %492 = vmatpush3.bf16.msra.mxu0 %v528_v17 }
  0x6a   :  { %493 = vmatprep.subr.bf16.mxu0 %v655_v0 }
  0x6d   :  { %494 = vmatpush3.bf16.msra.mxu0 %v529_v28 }
  0x6e   :  { %495 = vmatprep.subr.bf16.mxu0 %v655_v0 }
  0x71   :  { %496 = vmatpush3.bf16.msra.mxu0 %v530_v29 }
 0x126   :  { %v151_v19 = vpop.f32.mrb[0].mxu0 }
 0x127   :  { %v152_v20 = vadd.f32 %v409_v18, %v151_v19  ;;  %v459_v21 = vpop.f32.mrb[1].mxu0 }
 0x128   :  { %v154_v22 = vpop.f32.mrb[2].mxu0 }
 0x129   :  { %v155_v23 = vadd.f32 %v409_v18, %v154_v22  ;;  %v460_v24 = vpop.f32.mrb[3].mxu0  ;;  %v158_v25 = vmax.f32 %v152_v20, 0.0 }
 0x12b   :  { %v159_v26 = vmax.f32 %v155_v23, 0.0 }
 0x12d   :  { %v160_v27 = vpack.c.bf16 %v159_v26, %v158_v25 }
 0x12f   :  { %478 = vmatmul.mubr.bf16.vlgmr.msra.gmra.mrb[0].mxu1 %v160_v27 }
 0x202   :  { %v266_v31 = vpop.f32.mrb[0].mxu1 }
 0x203   :  { %v267_v32 = vadd.f32 %v414_v30, %v266_v31  ;;  %v479_v33 = vpop.f32.mrb[1].mxu1 }
 0x204   :  { %v269_v34 = vpop.f32.mrb[2].mxu1 }
 0x205   :  { %v270_v35 = vadd.f32 %v414_v30, %v269_v34  ;;  %v480_v36 = vpop.f32.mrb[3].mxu1  ;;  %v273_v37 = vmax.f32 %v267_v32, 0.0 }
 0x207   :  { %v274_v38 = vmax.f32 %v270_v35, 0.0 }
 0x209   :  { %v275_v39 = vpack.c.bf16 %v274_v38, %v273_v37 }
 0x20b   :  { %498 = vmatmul.mubr.bf16.vlgmr.msra.gmra.mrb[4].mxu0 %v275_v39 }
 0x2de   :  { %v381_v41 = vpop.f32.mrb[4].mxu0 }
 0x2df   :  { %v382_v42 = vadd.f32 %v423_v40, %v381_v41  ;;  %v499_v43 = vpop.f32.mrb[5].mxu0 }
 0x2e0   :  { %v384_v44 = vpop.f32.mrb[6].mxu0 }
 0x2e1   :  { %388 = vst [vmem:[#allocation10] sm:$0xff] %v382_v42  ;;  %v385_v45 = vadd.f32 %v423_v40, %v384_v44  ;;  %v500_v46 = vpop.f32.mrb[7].mxu0 }
 0x2e3   :  { %389 = vst [vmem:[#allocation10 + $0x8] sm:$0xff] %v385_v45 }
 0x2e4   :  { %630 = shalt.err (!%p627_p8)
}
 0x2e5   :  { %s631_s9 = scalar_lea.hbm %s826_s7, 256 }
 0x2e6   :  { %p632_p9 = scmp.ne.s32.totalorder %s826_s7, %s631_s9  ;;  %p635_p10 = scmp.lt.u32.totalorder %s631_s9, %s826_s7 }
 0x2e8   :  { %p637_p11 = pnand %p635_p10, %p632_p9 }
 0x2ea   :  { %640 = shalt.err (!%p637_p11)
}
 0x2eb   :  { %s658_s16 = smov 128   ;;  %s659_s0 = smov 8  }
 0x2ec   :  { %401 = dma.vmem_to_hbm [thread:$0]  %s396_s30, 256, %s826_s7, [#allocation4], %s658_s16, %s658_s16, %s659_s0  }
 0x2ed   :  { %647 = dma.done.wait [#allocation4], 256  }
 0x2ee   :  { %648 = vsyncadd [#allocation4], 4294967040 }
 0x2ef   :  { %405 = vsyncpa [#allocation3], 1 }
 0x2f0   :  { %406 = vsyncpa [#allocation6], 1 }
 0x2f1   :  { %407 = vsyncpa [#allocation9], 1 }
 0x2f2   :  { %408 = vsyncpa [#allocation4], 1 }

</bundles_post_ra>
